<compile_context>
chip_gen: v6e
topology: v6e:2x2x1
jax: 0.10.0
libtpu: 0.0.40
codegen_flags: <defaults>
</compile_context>

<pallas_src>
import functools

import jax
import jax.numpy as jnp
from jax.experimental import pallas as pl
from jax.experimental.pallas import tpu as pltpu


IMAGENET_MEAN = jnp.array([0.485, 0.456, 0.406], jnp.float32)
IMAGENET_STD = jnp.array([0.229, 0.224, 0.225], jnp.float32)

RESNET50_CFG = ((64, 3, 1), (128, 4, 2), (256, 6, 2), (512, 3, 2))

_VMEM_LIMIT = 36 * 1024 * 1024          # < 64 MiB/TC on v7x, ample on v5e/v6e
_CONV_XBLOCK_MAX_BYTES = 8 * 1024 * 1024  # per-image block fallback threshold


# ==========================================================================
# Pallas kernel 1:  C = act(A @ B + bias [+ residual])     (B VMEM-resident)
# ==========================================================================
def _matmul_kernel(a_ref, b_ref, bias_ref, *rest, relu, has_res):
    if has_res:
        res_ref, o_ref = rest
    else:
        (o_ref,) = rest
    y = jnp.dot(a_ref[...], b_ref[...], preferred_element_type=jnp.float32)
    y = y + bias_ref[...]
    if has_res:
        y = y + res_ref[...].astype(jnp.float32)
    if relu:
        y = jnp.maximum(y, 0.0)
    o_ref[...] = y.astype(o_ref.dtype)


@functools.partial(jax.jit, static_argnames=("relu", "out_dtype"))
def matmul_bias_act(a, b, bias, residual=None, relu=False,
                    out_dtype=jnp.bfloat16):
    """C = act(A @ B + bias [+ residual]).

    A:(M,K)  B:(K,N) bf16 (pre-reshaped at init)  bias:(1,N) f32
    residual:(M,N) or None.  No activation padding / output slicing: blocks
    use the full K / N extents, the M axis may be ragged (Pallas masks it).
    """
    M, K = a.shape
    _, Nout = b.shape
    a = a.astype(jnp.bfloat16)

    tm = M if M <= 512 else 512
    mi = pl.cdiv(M, tm)
    # When there is only one M block, split N in two so both v7x cores work.
    if mi == 1 and Nout % 256 == 0:
        nj, tn = 2, Nout // 2
    else:
        nj, tn = 1, Nout

    has_res = residual is not None
    in_specs = [
        pl.BlockSpec((tm, K), lambda i, j: (i, 0)),      # A streams over M
        pl.BlockSpec((K, tn), lambda i, j: (0, j)),      # B resident in VMEM
        pl.BlockSpec((1, tn), lambda i, j: (0, j)),      # bias resident
    ]
    inputs = [a, b, bias]
    if has_res:
        in_specs.append(pl.BlockSpec((tm, tn), lambda i, j: (i, j)))
        inputs.append(residual)
    out_spec = pl.BlockSpec((tm, tn), lambda i, j: (i, j))

    kernel = functools.partial(_matmul_kernel, relu=relu, has_res=has_res)
    return pl.pallas_call(
        kernel,
        out_shape=jax.ShapeDtypeStruct((M, Nout), out_dtype),
        grid_spec=pltpu.PrefetchScalarGridSpec(
            num_scalar_prefetch=0,
            grid=(mi, nj),
            in_specs=in_specs,
            out_specs=out_spec,
        ),
        compiler_params=pltpu.CompilerParams(
            dimension_semantics=("parallel", "parallel"),
            vmem_limit_bytes=_VMEM_LIMIT),
    )(*inputs)


# ==========================================================================
# Pallas kernel 2:  3x3 stride-1 conv with fused taps (no im2col in HBM)
# ==========================================================================
def _conv3x3_s1_kernel(x_ref, w_ref, b_ref, o_ref, *, Wp, Ho, Wo, relu):
    # x_ref : (1, Hp*Wp, Cin)  one padded image, flattened rows
    # w_ref : (9, Cin, Cout)   VMEM-resident weights (tap-major)
    # b_ref : (1, Cout)
    # o_ref : (1, Ho, Wo, Cout)
    Mimg = Ho * Wp
    acc = None
    for t in range(9):
        i, j = divmod(t, 3)
        start = i * Wp + j                       # static shifted window
        a = x_ref[0, start:start + Mimg, :]
        p = jnp.dot(a, w_ref[t], preferred_element_type=jnp.float32)
        acc = p if acc is None else acc + p
    y = acc + b_ref[...]
    if relu:
        y = jnp.maximum(y, 0.0)
    y = y.astype(o_ref.dtype)
    # Store only the Wo valid columns of each output row (garbage columns at
    # w >= Wo are never written, so no post-kernel slicing is needed).
    for h in range(Ho):
        o_ref[0, h] = y[h * Wp:h * Wp + Wo, :]


@functools.partial(jax.jit, static_argnames=("relu",))
def conv3x3_s1(x, w_taps, bias, relu=True):
    """3x3, stride 1, pad 1 conv.  x:(N,H,W,Cin) bf16; w_taps:(9,Cin,Cout) bf16."""
    N, H, W, Cin = x.shape
    Cout = w_taps.shape[-1]
    Ho, Wo = H, W
    Wp = W + 2
    Hp = H + 3          # pad H by (1, 2): one extra bottom row covers tap overrun

    if Hp * Wp * Cin * 2 > _CONV_XBLOCK_MAX_BYTES:
        # Huge images: per-image block would not fit comfortably in VMEM.
        return conv_im2col(x, w_taps.reshape(-1, Cout), bias,
                           kh=3, kw=3, stride=1, pad=1, relu=relu)

    xp = jnp.pad(x, ((0, 0), (1, 2), (1, 1), (0, 0)))
    xf = xp.reshape(N, Hp * Wp, Cin)             # free reshape

    kernel = functools.partial(_conv3x3_s1_kernel, Wp=Wp, Ho=Ho, Wo=Wo, relu=relu)
    return pl.pallas_call(
        kernel,
        out_shape=jax.ShapeDtypeStruct((N, Ho, Wo, Cout), jnp.bfloat16),
        grid_spec=pltpu.PrefetchScalarGridSpec(
            num_scalar_prefetch=0,
            grid=(N,),
            in_specs=[
                pl.BlockSpec((1, Hp * Wp, Cin), lambda n: (n, 0, 0)),
                pl.BlockSpec((9, Cin, Cout), lambda n: (0, 0, 0)),   # resident
                pl.BlockSpec((1, Cout), lambda n: (0, 0)),           # resident
            ],
            out_specs=pl.BlockSpec((1, Ho, Wo, Cout), lambda n: (n, 0, 0, 0)),
        ),
        compiler_params=pltpu.CompilerParams(
            dimension_semantics=("parallel",),
            vmem_limit_bytes=_VMEM_LIMIT),
    )(xf, w_taps, bias)


# ==========================================================================
# Conv helpers built on the Pallas kernels
# ==========================================================================
@functools.partial(jax.jit, static_argnames=("stride", "relu"))
def conv1x1(x, w, bias, residual=None, stride=1, relu=True):
    """1x1 conv.  w:(Cin,Cout) bf16, bias:(1,Cout) f32.  Optional fused residual."""
    if stride > 1:
        x = x[:, ::stride, ::stride, :]
    N, H, W, C = x.shape
    Cout = w.shape[-1]
    a = x.reshape(N * H * W, C)
    res = None
    if residual is not None:
        res = residual.reshape(N * H * W, Cout)
    y = matmul_bias_act(a, w, bias, residual=res, relu=relu)
    return y.reshape(N, H, W, Cout)


@functools.partial(jax.jit, static_argnames=("kh", "kw", "stride", "pad", "relu"))
def conv_im2col(x, wflat, bias, kh, kw, stride, pad, relu=True):
    """Generic conv via im2col + Pallas matmul (used for the stem 7x7 s2 and the
    three 3x3 stride-2 convs only)."""
    # TODO(synk): fold stride-2 taps into the Pallas k-grid (space-to-depth) too.
    N, H, W, C = x.shape
    Cout = wflat.shape[-1]
    Ho = (H + 2 * pad - kh) // stride + 1
    Wo = (W + 2 * pad - kw) // stride + 1
    xp = jnp.pad(x, ((0, 0), (pad, pad), (pad, pad), (0, 0))) if pad else x
    cols = []
    for i in range(kh):
        for j in range(kw):
            cols.append(xp[:, i:i + stride * (Ho - 1) + 1:stride,
                           j:j + stride * (Wo - 1) + 1:stride, :])
    a = jnp.stack(cols, axis=3).reshape(N * Ho * Wo, kh * kw * C)
    y = matmul_bias_act(a, wflat, bias, relu=relu)
    return y.reshape(N, Ho, Wo, Cout)


def conv3x3(x, w, bias, stride, relu=True):
    if stride == 1:
        return conv3x3_s1(x, w, bias, relu=relu)
    return conv_im2col(x, w, bias, kh=3, kw=3, stride=stride, pad=1, relu=relu)


@jax.jit
def maxpool2d_3x3_s2(x):
    # Not a hot path; plain JAX.  Matches nn.MaxPool2d(3, stride=2, padding=1).
    N, H, W, C = x.shape
    k, stride, pad = 3, 2, 1
    xp = jnp.pad(x, ((0, 0), (pad, pad), (pad, pad), (0, 0)),
                 constant_values=-jnp.inf)
    Ho = (H + 2 * pad - k) // stride + 1
    Wo = (W + 2 * pad - k) // stride + 1
    cols = []
    for i in range(k):
        for j in range(k):
            cols.append(xp[:, i:i + stride * (Ho - 1) + 1:stride,
                           j:j + stride * (Wo - 1) + 1:stride, :])
    return jnp.max(jnp.stack(cols, axis=0), axis=0)


# ==========================================================================
# Deterministic parameter construction (synthetic weights, BN folded,
# pre-reshaped / pre-cast at init)
# ==========================================================================
def _fold_bn(w, gamma, beta, mean, var, eps=1e-5):
    scale = gamma / jnp.sqrt(var + eps)
    return w * scale, beta - mean * scale


def _init_conv_bn(key, kh, kw, cin, cout):
    k1, k2, k3, k4, k5 = jax.random.split(key, 5)
    fan_in = kh * kw * cin
    w = jax.random.normal(k1, (kh, kw, cin, cout), jnp.float32) * jnp.sqrt(2.0 / fan_in)
    gamma = 1.0 + 0.01 * jax.random.normal(k2, (cout,), jnp.float32)
    beta = 0.01 * jax.random.normal(k3, (cout,), jnp.float32)
    mean = 0.01 * jax.random.normal(k4, (cout,), jnp.float32)
    var = 1.0 + 0.1 * jax.random.uniform(k5, (cout,), jnp.float32)
    return _fold_bn(w, gamma, beta, mean, var)


def _prep(wb, kind):
    """Pre-reshape + pre-cast once at init: no per-call weight pad/reshape."""
    w, b = wb                                    # w:(kh,kw,Cin,Cout), b:(Cout,)
    kh, kw, cin, cout = w.shape
    if kind == "1x1":
        wq = w.reshape(cin, cout)
    elif kind == "taps":                         # stride-1 3x3 fused-tap kernel
        wq = w.reshape(kh * kw, cin, cout)
    else:                                        # "flat": im2col path
        wq = w.reshape(kh * kw * cin, cout)
    return wq.astype(jnp.bfloat16), b.reshape(1, cout).astype(jnp.float32)


def make_resnet50_params(key):
    keys = iter(jax.random.split(key, 256))

    # --- stem conv+BN with ImageNet normalization folded in ---------------
    stem_w, stem_b = _init_conv_bn(next(keys), 7, 7, 3, 64)
    inv_std = 1.0 / IMAGENET_STD
    stem_w_n = stem_w * inv_std.reshape(1, 1, 3, 1)
    stem_b_n = stem_b - jnp.einsum("ijco,c->o", stem_w, IMAGENET_MEAN * inv_std)
    params = {
        "stem_w": stem_w_n.reshape(7 * 7 * 3, 64).astype(jnp.bfloat16),
        "stem_b": stem_b_n.reshape(1, 64).astype(jnp.float32),
        # border padding value for the stem: raw mean == 0 after normalization
        "pad_value": IMAGENET_MEAN.astype(jnp.bfloat16),
    }

    layers = []
    inplanes = 64
    for planes, blocks, stride in RESNET50_CFG:
        blk_list = []
        for b in range(blocks):
            s = stride if b == 0 else 1
            c1w, c1b = _prep(_init_conv_bn(next(keys), 1, 1, inplanes, planes), "1x1")
            c2w, c2b = _prep(_init_conv_bn(next(keys), 3, 3, planes, planes),
                             "taps" if s == 1 else "flat")
            c3w, c3b = _prep(_init_conv_bn(next(keys), 1, 1, planes, planes * 4), "1x1")
            block = {"conv1_w": c1w, "conv1_b": c1b,
                     "conv2_w": c2w, "conv2_b": c2b,
                     "conv3_w": c3w, "conv3_b": c3b}
            if b == 0:   # torchvision: downsample when stride!=1 or inplanes!=planes*4
                dw, db = _prep(_init_conv_bn(next(keys), 1, 1, inplanes, planes * 4), "1x1")
                block["down_w"], block["down_b"] = dw, db
            blk_list.append(block)
            inplanes = planes * 4
        layers.append(blk_list)
    params["layers"] = layers

    kf1, kf2 = jax.random.split(next(keys))
    fc_w = jax.random.normal(kf1, (2048, 1000), jnp.float32) / jnp.sqrt(2048.0)
    params["fc_w"] = fc_w.astype(jnp.bfloat16)
    params["fc_b"] = (0.01 * jax.random.normal(kf2, (1000,), jnp.float32)).reshape(1, 1000)
    return params


# ==========================================================================
# Forward pass (== OuterModel.forward with torchvision resnet50 inside)
# ==========================================================================
def _bottleneck(x, blk, stride, has_down):
    if has_down:
        identity = conv1x1(x, blk["down_w"], blk["down_b"],
                           stride=stride, relu=False)
    else:
        identity = x
    out = conv1x1(x, blk["conv1_w"], blk["conv1_b"], relu=True)
    out = conv3x3(out, blk["conv2_w"], blk["conv2_b"], stride=stride, relu=True)
    # residual add + ReLU fused into the conv3 matmul epilogue
    out = conv1x1(out, blk["conv3_w"], blk["conv3_b"],
                  residual=identity, relu=True)
    return out


def outer_model_forward(params, x_nhwc):
    # ImageNet normalization is folded into the stem conv.  To keep the fold
    # exact at the conv border, the raw input is padded with the per-channel
    # ImageNet means (which normalize to 0), then the stem runs with pad=0.
    # The PyTorch .permute(0,3,1,2) is a pure layout change — we stay NHWC.
    x = x_nhwc.astype(jnp.bfloat16)
    N, H, W, _ = x.shape
    xp = jnp.broadcast_to(params["pad_value"].reshape(1, 1, 1, 3),
                          (N, H + 6, W + 6, 3))
    xp = xp.at[:, 3:H + 3, 3:W + 3, :].set(x)

    x = conv_im2col(xp, params["stem_w"], params["stem_b"],
                    kh=7, kw=7, stride=2, pad=0, relu=True)
    x = maxpool2d_3x3_s2(x)

    for li, (planes, blocks, stride) in enumerate(RESNET50_CFG):
        for bi in range(blocks):
            s = stride if bi == 0 else 1
            x = _bottleneck(x, params["layers"][li][bi], s, has_down=(bi == 0))

    # adaptive avg pool to (1,1) + FC (logits in f32)
    feats = x.astype(jnp.float32).mean(axis=(1, 2))          # (N, 2048)
    logits = matmul_bias_act(feats, params["fc_w"], params["fc_b"],
                             relu=False, out_dtype=jnp.float32)
    return logits                                            # (N, 1000)


# ==========================================================================
if __name__ == "__main__":
    key = jax.random.PRNGKey(0)
    k_params, k_input = jax.random.split(key)

    params = make_resnet50_params(k_params)
    # Small image batch: NHWC in [0,1], 3 channels (what OuterModel expects
    # before its internal permute).  32x32 keeps every conv well-defined.
    x = jax.random.uniform(k_input, (2, 32, 32, 3), jnp.float32)

    logits = outer_model_forward(params, x)
    logits = jax.block_until_ready(logits)

    assert logits.shape == (2, 1000), logits.shape
    assert bool(jnp.all(jnp.isfinite(logits)))
    print("KERNEL_OK")
</pallas_src>

<mosaic_0001>
module attributes {stable_mosaic.version = 11 : i64} {
  func.func @_matmul_kernel(%arg0: i32, %arg1: i32, %arg2: memref<512x147xbf16, #tpu.memory_space<vmem>>, %arg3: memref<147x64xbf16, #tpu.memory_space<vmem>>, %arg4: memref<1x64xf32, #tpu.memory_space<vmem>>, %arg5: memref<512x64xbf16, #tpu.memory_space<vmem>>) attributes {dimension_semantics = [#tpu.dimension_semantics<parallel>, #tpu.dimension_semantics<parallel>], iteration_bounds = array<i64: 1, 1>, scalar_prefetch = 0 : i64, scratch_operands = 0 : i64, tpu.core_type = #tpu.core_type<tc>, window_params = [{transform_indices = @transform_0, window_bounds = array<i64: 512, 147>}, {transform_indices = @transform_1, window_bounds = array<i64: 147, 64>}, {transform_indices = @transform_2, window_bounds = array<i64: 1, 64>}, {transform_indices = @transform_3, window_bounds = array<i64: 512, 64>}]} {
    %c0 = arith.constant 0 : index
    %c0_0 = arith.constant 0 : index
    %0 = vector.load %arg2[%c0, %c0_0] : memref<512x147xbf16, #tpu.memory_space<vmem>>, vector<512x147xbf16>
    %c0_1 = arith.constant 0 : index
    %c0_2 = arith.constant 0 : index
    %1 = vector.load %arg3[%c0_1, %c0_2] : memref<147x64xbf16, #tpu.memory_space<vmem>>, vector<147x64xbf16>
    %cst = arith.constant dense<0.000000e+00> : vector<512x64xf32>
    %2 = tpu.matmul %0, %1, %cst {dimension_numbers = #tpu.dot_dimension_numbers<[1], [0], [0], [1], [0, 0, 1, 1], [], []>} : vector<512x147xbf16>, vector<147x64xbf16>, vector<512x64xf32> -> vector<512x64xf32>
    %c0_3 = arith.constant 0 : index
    %c0_4 = arith.constant 0 : index
    %3 = vector.load %arg4[%c0_3, %c0_4] : memref<1x64xf32, #tpu.memory_space<vmem>>, vector<1x64xf32>
    %4 = vector.broadcast %3 : vector<1x64xf32> to vector<512x64xf32>
    %5 = arith.addf %2, %4 : vector<512x64xf32>
    %cst_5 = arith.constant 0.000000e+00 : f32
    %6 = vector.broadcast %cst_5 : f32 to vector<512x64xf32>
    %7 = arith.maximumf %5, %6 : vector<512x64xf32>
    %8 = arith.truncf %7 : vector<512x64xf32> to vector<512x64xbf16>
    %c0_6 = arith.constant 0 : index
    %c0_7 = arith.constant 0 : index
    %9 = vector.load %arg5[%c0_6, %c0_7] : memref<512x64xbf16, #tpu.memory_space<vmem>>, vector<512x64xbf16>
    tpu.vector_store %arg5[%c0_6, %c0_7], %8 {strides = array<i32>} : memref<512x64xbf16, #tpu.memory_space<vmem>>, vector<512x64xbf16>,
    return
  }
  func.func @transform_0(%arg0: i32, %arg1: i32) -> (i32, i32) {
    %c0_i32 = arith.constant 0 : i32
    %c0_i32_0 = arith.constant 0 : i32
    return %arg0, %c0_i32 : i32, i32
  }
  func.func @transform_1(%arg0: i32, %arg1: i32) -> (i32, i32) {
    %c0_i32 = arith.constant 0 : i32
    %c0_i32_0 = arith.constant 0 : i32
    return %c0_i32, %arg1 : i32, i32
  }
  func.func @transform_2(%arg0: i32, %arg1: i32) -> (i32, i32) {
    %c0_i32 = arith.constant 0 : i32
    %c0_i32_0 = arith.constant 0 : i32
    return %c0_i32, %arg1 : i32, i32
  }
  func.func @transform_3(%arg0: i32, %arg1: i32) -> (i32, i32) {
    %c0_i32 = arith.constant 0 : i32
    return %arg0, %arg1 : i32, i32
  }
}

</mosaic_0001>

<bundles_post_ra>
// kernel: matmul_bias_act.1
= control target key start
LH: loop header
LB: loop body
LE: loop exit
PB: predicated region body
PF: predicated region fallthrough
CT: control target
= control target key end

     0   :  { %v1595_v0 = vmov 0   ;;  %vm450_vm0 = vcmask 154624   ;;  %vm547_vm1 = vcmask 1040384   ;;  %vm548_vm2 = vcmask 1041408   ;;  %s2196_s1 = inlined_call_operand.vmem [shape: bf16[147,64], index: 1, kind: input, shape index: {}]   ;;  %s2197_s0 = inlined_call_operand.vmem [shape: bf16[512,147], index: 0, kind: input, shape index: {}]   ;;  %s2198_s2 = inlined_call_operand.vmem [shape: f32[1,64], index: 2, kind: input, shape index: {}]   ;;  %s2199_s3 = inlined_call_operand.vmem [shape: bf16[512,64], index: 3, kind: output, shape index: {}]  }
   0x1   :  { %554 = vmatprep.subr.bf16.mxu0 %v1595_v0  ;;  %1467 = vmatprep.subr.bf16.mxu1 %v1595_v0  ;;  %v1489_v1 = vld [vmem:[%s2196_s1 + $0x38] sm:$0xff]   ;;  %v1490_v2 = vld [vmem:[%s2196_s1 + $0x30] sm:$0xff]   ;;  %v1491_v3 = vld [vmem:[%s2196_s1 + $0x28] sm:$0xff]   ;;  %v1596_v10 = vmov 65535   ;;  %vm1163_vm3 = vcmask 519168  }
   0x2   :  { %555 = vmatpush1.bf16.msra.mxu0 %v1489_v1  ;;  %1477 = vmatpush1.bf16.msra.mxu1 %v1489_v1  ;;  %v1492_v4 = vld [vmem:[%s2196_s1 + $0x20] sm:$0xff]   ;;  %v1493_v7 = vld [vmem:[%s2196_s1 + $0x18] sm:$0xff]   ;;  %v1494_v8 = vld [vmem:[%s2196_s1 + $0x10] sm:$0xff]   ;;  %v549_v11 = vsel %vm547_vm1, 4294967295, %v1596_v10 }
   0x3   :  { %556 = vmatprep.subr.bf16.mxu0 %v1595_v0  ;;  %1468 = vmatprep.subr.bf16.mxu1 %v1595_v0  ;;  %v1501_v5 = vld [vmem:[%s2197_s0 + $0x4] ss:$8 sps:$4 sm:$0xff]   ;;  %v1497_v13 = vld [vmem:[%s2196_s1 + $0x48] ss:$0 sps:$4 sm:$0x33]   ;;  %v550_v14 = vsel %vm548_vm2, %v549_v11, 0 }
   0x4   :  { %1307 = vmatprep.mubr.msk.bf16.mxu0 %vm450_vm0, %v1501_v5  ;;  %v1504_v6 = vld [vmem:[%s2197_s0 + $0x104] ss:$8 sps:$4 sm:$0xff]   ;;  %v552_v15 = vand.u32 %v1497_v13, %v550_v14  ;;  %v1499_v17 = vld [vmem:[%s2197_s0] ss:$8 sps:$4 sm:$0xff]   ;;  %v1505_v19 = vld [vmem:[%s2197_s0 + $0x14] ss:$8 sps:$4 sm:$0xff]  }
   0x5   :  { %1323 = vmatprep.mubr.msk.bf16.mxu1 %vm450_vm0, %v1504_v6  ;;  %v1495_v9 = vld [vmem:[%s2196_s1 + $0x8] sm:$0xff]   ;;  %v1496_v12 = vld [vmem:[%s2196_s1] sm:$0xff]   ;;  %v1507_v20 = vld [vmem:[%s2197_s0 + $0x114] ss:$8 sps:$4 sm:$0xff]  }
   0x6   :  { %557 = vmatpush1.bf16.msra.mxu0 %v1490_v2  ;;  %1478 = vmatpush1.bf16.msra.mxu1 %v1490_v2  ;;  %v1498_v16 = vld [vmem:[%s2196_s1 + $0x40] sm:$0xff]   ;;  %v1509_v21 = vld [vmem:[%s2197_s0 + $0x10] ss:$8 sps:$4 sm:$0xff]   ;;  %v1517_v27 = vld [vmem:[%s2197_s0 + $0x34] ss:$8 sps:$4 sm:$0xff]  }
   0x7   :  { %558 = vmatprep.subr.bf16.mxu0 %v1595_v0  ;;  %1469 = vmatprep.subr.bf16.mxu1 %v1595_v0  ;;  %v1502_v18 = vld [vmem:[%s2197_s0 + $0x100] ss:$8 sps:$4 sm:$0xff]   ;;  %v1510_v22 = vld [vmem:[%s2197_s0 + $0x110] ss:$8 sps:$4 sm:$0xff]   ;;  %v1511_v23 = vld [vmem:[%s2197_s0 + $0x24] ss:$8 sps:$4 sm:$0xff]  }
   0x8   :  { %v1513_v24 = vld [vmem:[%s2197_s0 + $0x124] ss:$8 sps:$4 sm:$0xff]   ;;  %v1515_v25 = vld [vmem:[%s2197_s0 + $0x20] ss:$8 sps:$4 sm:$0xff]   ;;  %v1519_v28 = vld [vmem:[%s2197_s0 + $0x134] ss:$8 sps:$4 sm:$0xff]  }
   0x9   :  { %v1516_v26 = vld [vmem:[%s2197_s0 + $0x120] ss:$8 sps:$4 sm:$0xff]   ;;  %v1521_v29 = vld [vmem:[%s2197_s0 + $0x30] ss:$8 sps:$4 sm:$0xff]   ;;  %v1523_v31 = vld [vmem:[%s2197_s0 + $0x44] ss:$8 sps:$4 sm:$0xff]  }
   0xa   :  { %559 = vmatpush1.bf16.msra.mxu0 %v1491_v3  ;;  %1479 = vmatpush1.bf16.msra.mxu1 %v1491_v3  ;;  %v1522_v30 = vld [vmem:[%s2197_s0 + $0x130] ss:$8 sps:$4 sm:$0xff]   ;;  %v1525_v32 = vld [vmem:[%s2197_s0 + $0x144] ss:$8 sps:$4 sm:$0xff]   ;;  %v1527_v33 = vld [vmem:[%s2197_s0 + $0x40] ss:$8 sps:$4 sm:$0xff]  }
   0xb   :  { %560 = vmatprep.subr.bf16.mxu0 %v1595_v0  ;;  %1470 = vmatprep.subr.bf16.mxu1 %v1595_v0  ;;  %v1528_v34 = vld [vmem:[%s2197_s0 + $0x140] ss:$8 sps:$4 sm:$0xff]   ;;  %v1529_v35 = vld [vmem:[%s2197_s0 + $0x54] ss:$8 sps:$4 sm:$0xff]   ;;  %v1533_v37 = vld [vmem:[%s2197_s0 + $0x50] ss:$8 sps:$4 sm:$0xff]  }
   0xc   :  { %v1531_v36 = vld [vmem:[%s2197_s0 + $0x154] ss:$8 sps:$4 sm:$0xff]   ;;  %v1534_v38 = vld [vmem:[%s2197_s0 + $0x150] ss:$8 sps:$4 sm:$0xff]   ;;  %v1535_v39 = vld [vmem:[%s2197_s0 + $0x64] ss:$8 sps:$4 sm:$0xff]  }
   0xd   :  { %v1537_v40 = vld [vmem:[%s2197_s0 + $0x164] ss:$8 sps:$4 sm:$0xff]   ;;  %v1539_v41 = vld [vmem:[%s2197_s0 + $0x60] ss:$8 sps:$4 sm:$0xff]   ;;  %v1541_v43 = vld [vmem:[%s2197_s0 + $0x74] ss:$8 sps:$4 sm:$0xff]  }
   0xe   :  { %561 = vmatpush1.bf16.msra.mxu0 %v1492_v4  ;;  %1480 = vmatpush1.bf16.msra.mxu1 %v1492_v4  ;;  %v1540_v42 = vld [vmem:[%s2197_s0 + $0x160] ss:$8 sps:$4 sm:$0xff]   ;;  %v1543_v44 = vld [vmem:[%s2197_s0 + $0x174] ss:$8 sps:$4 sm:$0xff]   ;;  %v1545_v45 = vld [vmem:[%s2197_s0 + $0x70] ss:$8 sps:$4 sm:$0xff]  }
   0xf   :  { %562 = vmatprep.subr.bf16.mxu0 %v1595_v0  ;;  %1471 = vmatprep.subr.bf16.mxu1 %v1595_v0  ;;  %v1546_v46 = vld [vmem:[%s2197_s0 + $0x170] ss:$8 sps:$4 sm:$0xff]   ;;  %v1547_v47 = vld [vmem:[%s2197_s0 + $0x84] ss:$8 sps:$4 sm:$0xff]   ;;  %v1551_v49 = vld [vmem:[%s2197_s0 + $0x80] ss:$8 sps:$4 sm:$0xff]  }
  0x10   :  { %v1549_v48 = vld [vmem:[%s2197_s0 + $0x184] ss:$8 sps:$4 sm:$0xff]   ;;  %v1552_v50 = vld [vmem:[%s2197_s0 + $0x180] ss:$8 sps:$4 sm:$0xff]   ;;  %v1553_v51 = vld [vmem:[%s2197_s0 + $0x94] ss:$8 sps:$4 sm:$0xff]  }
  0x11   :  { %v1555_v52 = vld [vmem:[%s2197_s0 + $0x194] ss:$8 sps:$4 sm:$0xff]   ;;  %v1557_v53 = vld [vmem:[%s2197_s0 + $0x90] ss:$8 sps:$4 sm:$0xff]   ;;  %v1559_v55 = vld [vmem:[%s2197_s0 + $0xa4] ss:$8 sps:$4 sm:$0xff]  }
  0x12   :  { %563 = vmatpush1.bf16.msra.mxu0 %v1493_v7  ;;  %1481 = vmatpush1.bf16.msra.mxu1 %v1493_v7  ;;  %v1558_v54 = vld [vmem:[%s2197_s0 + $0x190] ss:$8 sps:$4 sm:$0xff]   ;;  %v1561_v56 = vld [vmem:[%s2197_s0 + $0x1a4] ss:$8 sps:$4 sm:$0xff]   ;;  %v1563_v57 = vld [vmem:[%s2197_s0 + $0xa0] ss:$8 sps:$4 sm:$0xff]  }
  0x13   :  { %564 = vmatprep.subr.bf16.mxu0 %v1595_v0  ;;  %1472 = vmatprep.subr.bf16.mxu1 %v1595_v0  ;;  %v1564_v58 = vld [vmem:[%s2197_s0 + $0x1a0] ss:$8 sps:$4 sm:$0xff]   ;;  %v1565_v59 = vld [vmem:[%s2197_s0 + $0xb4] ss:$8 sps:$4 sm:$0xff]   ;;  %v1569_v61 = vld [vmem:[%s2197_s0 + $0xb0] ss:$8 sps:$4 sm:$0xff]  }
  0x14   :  { %v1567_v60 = vld [vmem:[%s2197_s0 + $0x1b4] ss:$8 sps:$4 sm:$0xff]   ;;  %v1570_v62 = vld [vmem:[%s2197_s0 + $0x1b0] ss:$8 sps:$4 sm:$0xff]   ;;  %v1571_v63 = vld [vmem:[%s2197_s0 + $0xc4] ss:$8 sps:$4 sm:$0xff]  }
  0x15   :  { %v1575_v1 = vld [vmem:[%s2197_s0 + $0xc0] ss:$8 sps:$4 sm:$0xff]   ;;  %v1577_v3 = vld [vmem:[%s2197_s0 + $0xd4] ss:$8 sps:$4 sm:$0xff]   ;;  %v1581_v5 = vld [vmem:[%s2197_s0 + $0xd0] ss:$8 sps:$4 sm:$0xff]  }
  0x16   :  { %565 = vmatpush1.bf16.msra.mxu0 %v1494_v8  ;;  %1482 = vmatpush1.bf16.msra.mxu1 %v1494_v8  ;;  %v1576_v2 = vld [vmem:[%s2197_s0 + $0x1c0] ss:$8 sps:$4 sm:$0xff]   ;;  %v1579_v4 = vld [vmem:[%s2197_s0 + $0x1d4] ss:$8 sps:$4 sm:$0xff]   ;;  %v1582_v6 = vld [vmem:[%s2197_s0 + $0x1d0] ss:$8 sps:$4 sm:$0xff]  }
  0x17   :  { %566 = vmatprep.subr.bf16.mxu0 %v1595_v0  ;;  %1473 = vmatprep.subr.bf16.mxu1 %v1595_v0  ;;  %v1583_v7 = vld [vmem:[%s2197_s0 + $0xe4] ss:$8 sps:$4 sm:$0xff]   ;;  %v1588_v10 = vld [vmem:[%s2197_s0 + $0x1e0] ss:$8 sps:$4 sm:$0xff]   ;;  %v1589_v11 = vld [vmem:[%s2197_s0 + $0xf4] ss:$8 sps:$4 sm:$0xff]  }
  0x18   :  { %v1585_v8 = vld [vmem:[%s2197_s0 + $0x1e4] ss:$8 sps:$4 sm:$0xff]   ;;  %v1593_v13 = vld [vmem:[%s2197_s0 + $0xf0] ss:$8 sps:$4 sm:$0xff]  }
  0x19   :  { %v1594_v14 = vld [vmem:[%s2197_s0 + $0x1f0] ss:$8 sps:$4 sm:$0xff]  }
  0x1a   :  { %567 = vmatpush1.bf16.msra.mxu0 %v1495_v9  ;;  %1483 = vmatpush1.bf16.msra.mxu1 %v1495_v9  ;;  %v1587_v9 = vld [vmem:[%s2197_s0 + $0xe0] ss:$8 sps:$4 sm:$0xff]  }
  0x1b   :  { %568 = vmatprep.subr.bf16.mxu0 %v1595_v0  ;;  %1474 = vmatprep.subr.bf16.mxu1 %v1595_v0 }
  0x1e   :  { %569 = vmatpush1.bf16.msra.mxu0 %v1496_v12  ;;  %1484 = vmatpush1.bf16.msra.mxu1 %v1496_v12  ;;  %v1591_v12 = vld [vmem:[%s2197_s0 + $0x1f4] ss:$8 sps:$4 sm:$0xff]  }
  0x1f   :  { %582 = vmatprep.subr.bf16.mxu0 %v1595_v0  ;;  %1475 = vmatprep.subr.bf16.mxu1 %v1595_v0 }
  0x22   :  { %583 = vmatpush2.bf16.msra.mxu0 %v552_v15  ;;  %1485 = vmatpush2.bf16.msra.mxu1 %v552_v15  ;;  %v1874_v15 = vld [vmem:[%s2198_s2] ss:$0 sm:$0xff] }
  0x23   :  { %584 = vmatprep.subr.bf16.mxu0 %v1595_v0  ;;  %1476 = vmatprep.subr.bf16.mxu1 %v1595_v0  ;;  %v1573_v0 = vld [vmem:[%s2197_s0 + $0x1c4] ss:$8 sps:$4 sm:$0xff]  }
  0x26   :  { %585 = vmatpush2.bf16.msra.mxu0 %v1498_v16  ;;  %1486 = vmatpush2.bf16.msra.mxu1 %v1498_v16 }
  0x29   :  { %587 = vmatmul.mubr.bf16.vlgmr.msra.gmra.mxu0 %v1499_v17  ;;  %715 = vmatmul.mubr.bf16.vlgmr.msra.gmra.mxu1 %v1502_v18 }
  0x2a   :  { %1308 = vmatprep.mubr.msk.bf16.mxu0 %vm450_vm0, %v1505_v19  ;;  %1324 = vmatprep.mubr.msk.bf16.mxu1 %vm450_vm0, %v1507_v20 }
  0x31   :  { %595 = vmatmul.mubr.bf16.gmra.mxu0 %v1509_v21  ;;  %723 = vmatmul.mubr.bf16.gmra.mxu1 %v1510_v22 }
  0x32   :  { %1309 = vmatprep.mubr.msk.bf16.mxu0 %vm450_vm0, %v1511_v23  ;;  %1325 = vmatprep.mubr.msk.bf16.mxu1 %vm450_vm0, %v1513_v24 }
  0x39   :  { %603 = vmatmul.mubr.bf16.gmra.mxu0 %v1515_v25  ;;  %731 = vmatmul.mubr.bf16.gmra.mxu1 %v1516_v26 }
  0x3a   :  { %1310 = vmatprep.mubr.msk.bf16.mxu0 %vm450_vm0, %v1517_v27  ;;  %1326 = vmatprep.mubr.msk.bf16.mxu1 %vm450_vm0, %v1519_v28 }
  0x41   :  { %611 = vmatmul.mubr.bf16.gmra.mxu0 %v1521_v29  ;;  %739 = vmatmul.mubr.bf16.gmra.mxu1 %v1522_v30 }
  0x42   :  { %1311 = vmatprep.mubr.msk.bf16.mxu0 %vm450_vm0, %v1523_v31  ;;  %1327 = vmatprep.mubr.msk.bf16.mxu1 %vm450_vm0, %v1525_v32 }
  0x49   :  { %619 = vmatmul.mubr.bf16.gmra.mxu0 %v1527_v33  ;;  %747 = vmatmul.mubr.bf16.gmra.mxu1 %v1528_v34 }
  0x4a   :  { %1312 = vmatprep.mubr.msk.bf16.mxu0 %vm450_vm0, %v1529_v35  ;;  %1328 = vmatprep.mubr.msk.bf16.mxu1 %vm450_vm0, %v1531_v36 }
  0x51   :  { %627 = vmatmul.mubr.bf16.gmra.mxu0 %v1533_v37  ;;  %755 = vmatmul.mubr.bf16.gmra.mxu1 %v1534_v38 }
  0x52   :  { %1313 = vmatprep.mubr.msk.bf16.mxu0 %vm450_vm0, %v1535_v39  ;;  %1329 = vmatprep.mubr.msk.bf16.mxu1 %vm450_vm0, %v1537_v40 }
  0x59   :  { %635 = vmatmul.mubr.bf16.gmra.mxu0 %v1539_v41  ;;  %763 = vmatmul.mubr.bf16.gmra.mxu1 %v1540_v42 }
  0x5a   :  { %1314 = vmatprep.mubr.msk.bf16.mxu0 %vm450_vm0, %v1541_v43  ;;  %1330 = vmatprep.mubr.msk.bf16.mxu1 %vm450_vm0, %v1543_v44 }
  0x61   :  { %643 = vmatmul.mubr.bf16.gmra.mxu0 %v1545_v45  ;;  %771 = vmatmul.mubr.bf16.gmra.mxu1 %v1546_v46 }
  0x62   :  { %1315 = vmatprep.mubr.msk.bf16.mxu0 %vm450_vm0, %v1547_v47  ;;  %1331 = vmatprep.mubr.msk.bf16.mxu1 %vm450_vm0, %v1549_v48 }
  0x69   :  { %651 = vmatmul.mubr.bf16.gmra.mxu0 %v1551_v49  ;;  %779 = vmatmul.mubr.bf16.gmra.mxu1 %v1552_v50 }
  0x6a   :  { %1316 = vmatprep.mubr.msk.bf16.mxu0 %vm450_vm0, %v1553_v51  ;;  %1332 = vmatprep.mubr.msk.bf16.mxu1 %vm450_vm0, %v1555_v52 }
  0x71   :  { %659 = vmatmul.mubr.bf16.gmra.mxu0 %v1557_v53  ;;  %787 = vmatmul.mubr.bf16.gmra.mxu1 %v1558_v54 }
  0x72   :  { %1317 = vmatprep.mubr.msk.bf16.mxu0 %vm450_vm0, %v1559_v55  ;;  %1333 = vmatprep.mubr.msk.bf16.mxu1 %vm450_vm0, %v1561_v56 }
  0x79   :  { %667 = vmatmul.mubr.bf16.gmra.mxu0 %v1563_v57  ;;  %795 = vmatmul.mubr.bf16.gmra.mxu1 %v1564_v58 }
  0x7a   :  { %1318 = vmatprep.mubr.msk.bf16.mxu0 %vm450_vm0, %v1565_v59  ;;  %1334 = vmatprep.mubr.msk.bf16.mxu1 %vm450_vm0, %v1567_v60 }
  0x81   :  { %675 = vmatmul.mubr.bf16.gmra.mxu0 %v1569_v61  ;;  %803 = vmatmul.mubr.bf16.gmra.mxu1 %v1570_v62 }
  0x82   :  { %1319 = vmatprep.mubr.msk.bf16.mxu0 %vm450_vm0, %v1571_v63  ;;  %1335 = vmatprep.mubr.msk.bf16.mxu1 %vm450_vm0, %v1573_v0 }
  0x89   :  { %683 = vmatmul.mubr.bf16.gmra.mxu0 %v1575_v1  ;;  %811 = vmatmul.mubr.bf16.gmra.mxu1 %v1576_v2 }
  0x8a   :  { %1320 = vmatprep.mubr.msk.bf16.mxu0 %vm450_vm0, %v1577_v3  ;;  %1336 = vmatprep.mubr.msk.bf16.mxu1 %vm450_vm0, %v1579_v4 }
  0x91   :  { %691 = vmatmul.mubr.bf16.gmra.mxu0 %v1581_v5  ;;  %819 = vmatmul.mubr.bf16.gmra.mxu1 %v1582_v6 }
  0x92   :  { %1321 = vmatprep.mubr.msk.bf16.mxu0 %vm450_vm0, %v1583_v7  ;;  %1337 = vmatprep.mubr.msk.bf16.mxu1 %vm450_vm0, %v1585_v8 }
  0x99   :  { %699 = vmatmul.mubr.bf16.gmra.mxu0 %v1587_v9  ;;  %827 = vmatmul.mubr.bf16.gmra.mxu1 %v1588_v10 }
  0x9a   :  { %1322 = vmatprep.mubr.msk.bf16.mxu0 %vm450_vm0, %v1589_v11  ;;  %1338 = vmatprep.mubr.msk.bf16.mxu1 %vm450_vm0, %v1591_v12 }
  0xa1   :  { %707 = vmatmul.mubr.bf16.gmra.mxu0 %v1593_v13  ;;  %835 = vmatmul.mubr.bf16.gmra.mxu1 %v1594_v14 }
  0xe9   :  { %v588_v16 = vpop.f32.mrf.mxu0  ;;  %v716_v17 = vpop.f32.mrf.mxu1 }
  0xea   :  { %v589_v18 = vadd.f32 %v1874_v15, %v588_v16  ;;  %v717_v19 = vadd.f32 %v1874_v15, %v716_v17 }
  0xeb   :  { %v590_v20 = vpop.f32.mrf.mxu0  ;;  %v718_v21 = vpop.f32.mrf.mxu1 }
  0xec   :  { %v843_v22 = vmax.f32 %v589_v18, 0.0  ;;  %v875_v23 = vmax.f32 %v717_v19, 0.0 }
  0xed   :  { %v591_v24 = vpop.f32.mrf.mxu0  ;;  %v719_v25 = vpop.f32.mrf.mxu1 }
  0xee   :  { %v1403_v26 = vpack.c.bf16 %v843_v22, %v843_v22  ;;  %v1435_v27 = vpack.c.bf16 %v875_v23, %v875_v23  ;;  %v592_v28 = vadd.f32 %v1874_v15, %v591_v24  ;;  %v720_v29 = vadd.f32 %v1874_v15, %v719_v25 }
  0xef   :  { %v593_v30 = vpop.f32.mrf.mxu0  ;;  %v721_v31 = vpop.f32.mrf.mxu1 }
  0xf0   :  { %1164 = vst.msk [vmem:[%s2199_s3] sm:$0xf] %vm1163_vm3, %v1403_v26  ;;  %1196 = vst.msk [vmem:[%s2199_s3 + $0x80] sm:$0xf] %vm1163_vm3, %v1435_v27  ;;  %v844_v32 = vmax.f32 %v592_v28, 0.0  ;;  %v876_v33 = vmax.f32 %v720_v29, 0.0 }
  0xf1   :  { %v596_v34 = vpop.f32.mrf.mxu0  ;;  %v724_v35 = vpop.f32.mrf.mxu1 }
  0xf2   :  { %v1404_v36 = vpack.c.bf16 %v844_v32, %v844_v32  ;;  %v1436_v37 = vpack.c.bf16 %v876_v33, %v876_v33  ;;  %v597_v38 = vadd.f32 %v1874_v15, %v596_v34  ;;  %v725_v39 = vadd.f32 %v1874_v15, %v724_v35 }
  0xf3   :  { %v598_v40 = vpop.f32.mrf.mxu0  ;;  %v726_v41 = vpop.f32.mrf.mxu1 }
  0xf4   :  { %1165 = vst.msk [vmem:[%s2199_s3 + $0x4] sm:$0xf] %vm1163_vm3, %v1404_v36  ;;  %1197 = vst.msk [vmem:[%s2199_s3 + $0x84] sm:$0xf] %vm1163_vm3, %v1436_v37  ;;  %v845_v42 = vmax.f32 %v597_v38, 0.0  ;;  %v877_v43 = vmax.f32 %v725_v39, 0.0 }
  0xf5   :  { %v599_v44 = vpop.f32.mrf.mxu0  ;;  %v727_v45 = vpop.f32.mrf.mxu1 }
  0xf6   :  { %v1405_v46 = vpack.c.bf16 %v845_v42, %v845_v42  ;;  %v1437_v47 = vpack.c.bf16 %v877_v43, %v877_v43  ;;  %v600_v48 = vadd.f32 %v1874_v15, %v599_v44  ;;  %v728_v49 = vadd.f32 %v1874_v15, %v727_v45 }
  0xf7   :  { %v601_v50 = vpop.f32.mrf.mxu0  ;;  %v729_v51 = vpop.f32.mrf.mxu1 }
  0xf8   :  { %1166 = vst.msk [vmem:[%s2199_s3 + $0x8] sm:$0xf] %vm1163_vm3, %v1405_v46  ;;  %1198 = vst.msk [vmem:[%s2199_s3 + $0x88] sm:$0xf] %vm1163_vm3, %v1437_v47  ;;  %v846_v52 = vmax.f32 %v600_v48, 0.0  ;;  %v878_v53 = vmax.f32 %v728_v49, 0.0 }
  0xf9   :  { %v604_v54 = vpop.f32.mrf.mxu0  ;;  %v732_v55 = vpop.f32.mrf.mxu1 }
  0xfa   :  { %v1406_v56 = vpack.c.bf16 %v846_v52, %v846_v52  ;;  %v1438_v57 = vpack.c.bf16 %v878_v53, %v878_v53  ;;  %v605_v58 = vadd.f32 %v1874_v15, %v604_v54  ;;  %v733_v59 = vadd.f32 %v1874_v15, %v732_v55 }
  0xfb   :  { %v606_v60 = vpop.f32.mrf.mxu0  ;;  %v734_v61 = vpop.f32.mrf.mxu1 }
  0xfc   :  { %1167 = vst.msk [vmem:[%s2199_s3 + $0xc] sm:$0xf] %vm1163_vm3, %v1406_v56  ;;  %1199 = vst.msk [vmem:[%s2199_s3 + $0x8c] sm:$0xf] %vm1163_vm3, %v1438_v57  ;;  %v847_v62 = vmax.f32 %v605_v58, 0.0  ;;  %v879_v63 = vmax.f32 %v733_v59, 0.0 }
  0xfd   :  { %v607_v0 = vpop.f32.mrf.mxu0  ;;  %v735_v1 = vpop.f32.mrf.mxu1 }
  0xfe   :  { %v1407_v2 = vpack.c.bf16 %v847_v62, %v847_v62  ;;  %v1439_v3 = vpack.c.bf16 %v879_v63, %v879_v63  ;;  %v608_v4 = vadd.f32 %v1874_v15, %v607_v0  ;;  %v736_v5 = vadd.f32 %v1874_v15, %v735_v1 }
  0xff   :  { %v609_v6 = vpop.f32.mrf.mxu0  ;;  %v737_v7 = vpop.f32.mrf.mxu1 }
 0x100   :  { %1168 = vst.msk [vmem:[%s2199_s3 + $0x10] sm:$0xf] %vm1163_vm3, %v1407_v2  ;;  %1200 = vst.msk [vmem:[%s2199_s3 + $0x90] sm:$0xf] %vm1163_vm3, %v1439_v3  ;;  %v848_v8 = vmax.f32 %v608_v4, 0.0  ;;  %v880_v9 = vmax.f32 %v736_v5, 0.0 }
 0x101   :  { %v612_v10 = vpop.f32.mrf.mxu0  ;;  %v740_v11 = vpop.f32.mrf.mxu1 }
 0x102   :  { %v1408_v12 = vpack.c.bf16 %v848_v8, %v848_v8  ;;  %v1440_v13 = vpack.c.bf16 %v880_v9, %v880_v9  ;;  %v613_v14 = vadd.f32 %v1874_v15, %v612_v10  ;;  %v741_v16 = vadd.f32 %v1874_v15, %v740_v11 }
 0x103   :  { %v614_v17 = vpop.f32.mrf.mxu0  ;;  %v742_v18 = vpop.f32.mrf.mxu1 }
 0x104   :  { %1169 = vst.msk [vmem:[%s2199_s3 + $0x14] sm:$0xf] %vm1163_vm3, %v1408_v12  ;;  %1201 = vst.msk [vmem:[%s2199_s3 + $0x94] sm:$0xf] %vm1163_vm3, %v1440_v13  ;;  %v849_v19 = vmax.f32 %v613_v14, 0.0  ;;  %v881_v20 = vmax.f32 %v741_v16, 0.0 }
 0x105   :  { %v615_v21 = vpop.f32.mrf.mxu0  ;;  %v743_v22 = vpop.f32.mrf.mxu1 }
 0x106   :  { %v1409_v23 = vpack.c.bf16 %v849_v19, %v849_v19  ;;  %v1441_v24 = vpack.c.bf16 %v881_v20, %v881_v20  ;;  %v616_v25 = vadd.f32 %v1874_v15, %v615_v21  ;;  %v744_v26 = vadd.f32 %v1874_v15, %v743_v22 }
 0x107   :  { %v617_v27 = vpop.f32.mrf.mxu0  ;;  %v745_v28 = vpop.f32.mrf.mxu1 }
 0x108   :  { %1170 = vst.msk [vmem:[%s2199_s3 + $0x18] sm:$0xf] %vm1163_vm3, %v1409_v23  ;;  %1202 = vst.msk [vmem:[%s2199_s3 + $0x98] sm:$0xf] %vm1163_vm3, %v1441_v24  ;;  %v850_v29 = vmax.f32 %v616_v25, 0.0  ;;  %v882_v30 = vmax.f32 %v744_v26, 0.0 }
 0x109   :  { %v620_v31 = vpop.f32.mrf.mxu0  ;;  %v748_v32 = vpop.f32.mrf.mxu1 }
 0x10a   :  { %v1410_v33 = vpack.c.bf16 %v850_v29, %v850_v29  ;;  %v1442_v34 = vpack.c.bf16 %v882_v30, %v882_v30  ;;  %v621_v35 = vadd.f32 %v1874_v15, %v620_v31  ;;  %v749_v36 = vadd.f32 %v1874_v15, %v748_v32 }
 0x10b   :  { %v622_v37 = vpop.f32.mrf.mxu0  ;;  %v750_v38 = vpop.f32.mrf.mxu1 }
 0x10c   :  { %1171 = vst.msk [vmem:[%s2199_s3 + $0x1c] sm:$0xf] %vm1163_vm3, %v1410_v33  ;;  %1203 = vst.msk [vmem:[%s2199_s3 + $0x9c] sm:$0xf] %vm1163_vm3, %v1442_v34  ;;  %v851_v39 = vmax.f32 %v621_v35, 0.0  ;;  %v883_v40 = vmax.f32 %v749_v36, 0.0 }
 0x10d   :  { %v623_v41 = vpop.f32.mrf.mxu0  ;;  %v751_v42 = vpop.f32.mrf.mxu1 }
 0x10e   :  { %v1411_v43 = vpack.c.bf16 %v851_v39, %v851_v39  ;;  %v1443_v44 = vpack.c.bf16 %v883_v40, %v883_v40  ;;  %v624_v45 = vadd.f32 %v1874_v15, %v623_v41  ;;  %v752_v46 = vadd.f32 %v1874_v15, %v751_v42 }
 0x10f   :  { %v625_v47 = vpop.f32.mrf.mxu0  ;;  %v753_v48 = vpop.f32.mrf.mxu1 }
 0x110   :  { %1172 = vst.msk [vmem:[%s2199_s3 + $0x20] sm:$0xf] %vm1163_vm3, %v1411_v43  ;;  %1204 = vst.msk [vmem:[%s2199_s3 + $0xa0] sm:$0xf] %vm1163_vm3, %v1443_v44  ;;  %v852_v49 = vmax.f32 %v624_v45, 0.0  ;;  %v884_v50 = vmax.f32 %v752_v46, 0.0 }
 0x111   :  { %v628_v51 = vpop.f32.mrf.mxu0  ;;  %v756_v52 = vpop.f32.mrf.mxu1 }
 0x112   :  { %v1412_v53 = vpack.c.bf16 %v852_v49, %v852_v49  ;;  %v1444_v54 = vpack.c.bf16 %v884_v50, %v884_v50  ;;  %v629_v55 = vadd.f32 %v1874_v15, %v628_v51  ;;  %v757_v56 = vadd.f32 %v1874_v15, %v756_v52 }
 0x113   :  { %v630_v57 = vpop.f32.mrf.mxu0  ;;  %v758_v58 = vpop.f32.mrf.mxu1 }
 0x114   :  { %1173 = vst.msk [vmem:[%s2199_s3 + $0x24] sm:$0xf] %vm1163_vm3, %v1412_v53  ;;  %1205 = vst.msk [vmem:[%s2199_s3 + $0xa4] sm:$0xf] %vm1163_vm3, %v1444_v54  ;;  %v853_v59 = vmax.f32 %v629_v55, 0.0  ;;  %v885_v60 = vmax.f32 %v757_v56, 0.0 }
 0x115   :  { %v631_v61 = vpop.f32.mrf.mxu0  ;;  %v759_v62 = vpop.f32.mrf.mxu1 }
 0x116   :  { %v1413_v63 = vpack.c.bf16 %v853_v59, %v853_v59  ;;  %v1445_v0 = vpack.c.bf16 %v885_v60, %v885_v60  ;;  %v632_v1 = vadd.f32 %v1874_v15, %v631_v61  ;;  %v760_v2 = vadd.f32 %v1874_v15, %v759_v62 }
 0x117   :  { %v633_v3 = vpop.f32.mrf.mxu0  ;;  %v761_v4 = vpop.f32.mrf.mxu1 }
 0x118   :  { %1174 = vst.msk [vmem:[%s2199_s3 + $0x28] sm:$0xf] %vm1163_vm3, %v1413_v63  ;;  %1206 = vst.msk [vmem:[%s2199_s3 + $0xa8] sm:$0xf] %vm1163_vm3, %v1445_v0  ;;  %v854_v5 = vmax.f32 %v632_v1, 0.0  ;;  %v886_v6 = vmax.f32 %v760_v2, 0.0 }
 0x119   :  { %v636_v7 = vpop.f32.mrf.mxu0  ;;  %v764_v8 = vpop.f32.mrf.mxu1 }
 0x11a   :  { %v1414_v9 = vpack.c.bf16 %v854_v5, %v854_v5  ;;  %v1446_v10 = vpack.c.bf16 %v886_v6, %v886_v6  ;;  %v637_v11 = vadd.f32 %v1874_v15, %v636_v7  ;;  %v765_v12 = vadd.f32 %v1874_v15, %v764_v8 }
 0x11b   :  { %v638_v13 = vpop.f32.mrf.mxu0  ;;  %v766_v14 = vpop.f32.mrf.mxu1 }
 0x11c   :  { %1175 = vst.msk [vmem:[%s2199_s3 + $0x2c] sm:$0xf] %vm1163_vm3, %v1414_v9  ;;  %1207 = vst.msk [vmem:[%s2199_s3 + $0xac] sm:$0xf] %vm1163_vm3, %v1446_v10  ;;  %v855_v16 = vmax.f32 %v637_v11, 0.0  ;;  %v887_v17 = vmax.f32 %v765_v12, 0.0 }
 0x11d   :  { %v639_v18 = vpop.f32.mrf.mxu0  ;;  %v767_v19 = vpop.f32.mrf.mxu1 }
 0x11e   :  { %v1415_v20 = vpack.c.bf16 %v855_v16, %v855_v16  ;;  %v1447_v21 = vpack.c.bf16 %v887_v17, %v887_v17  ;;  %v640_v22 = vadd.f32 %v1874_v15, %v639_v18  ;;  %v768_v23 = vadd.f32 %v1874_v15, %v767_v19 }
 0x11f   :  { %v641_v24 = vpop.f32.mrf.mxu0  ;;  %v769_v25 = vpop.f32.mrf.mxu1 }
 0x120   :  { %1176 = vst.msk [vmem:[%s2199_s3 + $0x30] sm:$0xf] %vm1163_vm3, %v1415_v20  ;;  %1208 = vst.msk [vmem:[%s2199_s3 + $0xb0] sm:$0xf] %vm1163_vm3, %v1447_v21  ;;  %v856_v26 = vmax.f32 %v640_v22, 0.0  ;;  %v888_v27 = vmax.f32 %v768_v23, 0.0 }
 0x121   :  { %v644_v28 = vpop.f32.mrf.mxu0  ;;  %v772_v29 = vpop.f32.mrf.mxu1 }
 0x122   :  { %v1416_v30 = vpack.c.bf16 %v856_v26, %v856_v26  ;;  %v1448_v31 = vpack.c.bf16 %v888_v27, %v888_v27  ;;  %v645_v32 = vadd.f32 %v1874_v15, %v644_v28  ;;  %v773_v33 = vadd.f32 %v1874_v15, %v772_v29 }
 0x123   :  { %v646_v34 = vpop.f32.mrf.mxu0  ;;  %v774_v35 = vpop.f32.mrf.mxu1 }
 0x124   :  { %1177 = vst.msk [vmem:[%s2199_s3 + $0x34] sm:$0xf] %vm1163_vm3, %v1416_v30  ;;  %1209 = vst.msk [vmem:[%s2199_s3 + $0xb4] sm:$0xf] %vm1163_vm3, %v1448_v31  ;;  %v857_v36 = vmax.f32 %v645_v32, 0.0  ;;  %v889_v37 = vmax.f32 %v773_v33, 0.0 }
 0x125   :  { %v647_v38 = vpop.f32.mrf.mxu0  ;;  %v775_v39 = vpop.f32.mrf.mxu1 }
 0x126   :  { %v1417_v40 = vpack.c.bf16 %v857_v36, %v857_v36  ;;  %v1449_v41 = vpack.c.bf16 %v889_v37, %v889_v37  ;;  %v648_v42 = vadd.f32 %v1874_v15, %v647_v38  ;;  %v776_v43 = vadd.f32 %v1874_v15, %v775_v39 }
 0x127   :  { %v649_v44 = vpop.f32.mrf.mxu0  ;;  %v777_v45 = vpop.f32.mrf.mxu1 }
 0x128   :  { %1178 = vst.msk [vmem:[%s2199_s3 + $0x38] sm:$0xf] %vm1163_vm3, %v1417_v40  ;;  %1210 = vst.msk [vmem:[%s2199_s3 + $0xb8] sm:$0xf] %vm1163_vm3, %v1449_v41  ;;  %v858_v46 = vmax.f32 %v648_v42, 0.0  ;;  %v890_v47 = vmax.f32 %v776_v43, 0.0 }
 0x129   :  { %v652_v48 = vpop.f32.mrf.mxu0  ;;  %v780_v49 = vpop.f32.mrf.mxu1 }
 0x12a   :  { %v1418_v50 = vpack.c.bf16 %v858_v46, %v858_v46  ;;  %v1450_v51 = vpack.c.bf16 %v890_v47, %v890_v47  ;;  %v653_v52 = vadd.f32 %v1874_v15, %v652_v48  ;;  %v781_v53 = vadd.f32 %v1874_v15, %v780_v49 }
 0x12b   :  { %v654_v54 = vpop.f32.mrf.mxu0  ;;  %v782_v55 = vpop.f32.mrf.mxu1 }
 0x12c   :  { %1179 = vst.msk [vmem:[%s2199_s3 + $0x3c] sm:$0xf] %vm1163_vm3, %v1418_v50  ;;  %1211 = vst.msk [vmem:[%s2199_s3 + $0xbc] sm:$0xf] %vm1163_vm3, %v1450_v51  ;;  %v859_v56 = vmax.f32 %v653_v52, 0.0  ;;  %v891_v57 = vmax.f32 %v781_v53, 0.0 }
 0x12d   :  { %v655_v58 = vpop.f32.mrf.mxu0  ;;  %v783_v59 = vpop.f32.mrf.mxu1 }
 0x12e   :  { %v1419_v60 = vpack.c.bf16 %v859_v56, %v859_v56  ;;  %v1451_v61 = vpack.c.bf16 %v891_v57, %v891_v57  ;;  %v656_v62 = vadd.f32 %v1874_v15, %v655_v58  ;;  %v784_v63 = vadd.f32 %v1874_v15, %v783_v59 }
 0x12f   :  { %v657_v0 = vpop.f32.mrf.mxu0  ;;  %v785_v1 = vpop.f32.mrf.mxu1 }
 0x130   :  { %1180 = vst.msk [vmem:[%s2199_s3 + $0x40] sm:$0xf] %vm1163_vm3, %v1419_v60  ;;  %1212 = vst.msk [vmem:[%s2199_s3 + $0xc0] sm:$0xf] %vm1163_vm3, %v1451_v61  ;;  %v860_v2 = vmax.f32 %v656_v62, 0.0  ;;  %v892_v3 = vmax.f32 %v784_v63, 0.0 }
 0x131   :  { %v660_v4 = vpop.f32.mrf.mxu0  ;;  %v788_v5 = vpop.f32.mrf.mxu1 }
 0x132   :  { %v1420_v6 = vpack.c.bf16 %v860_v2, %v860_v2  ;;  %v1452_v7 = vpack.c.bf16 %v892_v3, %v892_v3  ;;  %v661_v8 = vadd.f32 %v1874_v15, %v660_v4  ;;  %v789_v9 = vadd.f32 %v1874_v15, %v788_v5 }
 0x133   :  { %v662_v10 = vpop.f32.mrf.mxu0  ;;  %v790_v11 = vpop.f32.mrf.mxu1 }
 0x134   :  { %1181 = vst.msk [vmem:[%s2199_s3 + $0x44] sm:$0xf] %vm1163_vm3, %v1420_v6  ;;  %1213 = vst.msk [vmem:[%s2199_s3 + $0xc4] sm:$0xf] %vm1163_vm3, %v1452_v7  ;;  %v861_v12 = vmax.f32 %v661_v8, 0.0  ;;  %v893_v13 = vmax.f32 %v789_v9, 0.0 }
 0x135   :  { %v663_v14 = vpop.f32.mrf.mxu0  ;;  %v791_v16 = vpop.f32.mrf.mxu1 }
 0x136   :  { %v1421_v17 = vpack.c.bf16 %v861_v12, %v861_v12  ;;  %v1453_v18 = vpack.c.bf16 %v893_v13, %v893_v13  ;;  %v664_v19 = vadd.f32 %v1874_v15, %v663_v14  ;;  %v792_v20 = vadd.f32 %v1874_v15, %v791_v16 }
 0x137   :  { %v665_v21 = vpop.f32.mrf.mxu0  ;;  %v793_v22 = vpop.f32.mrf.mxu1 }
 0x138   :  { %1182 = vst.msk [vmem:[%s2199_s3 + $0x48] sm:$0xf] %vm1163_vm3, %v1421_v17  ;;  %1214 = vst.msk [vmem:[%s2199_s3 + $0xc8] sm:$0xf] %vm1163_vm3, %v1453_v18  ;;  %v862_v23 = vmax.f32 %v664_v19, 0.0  ;;  %v894_v24 = vmax.f32 %v792_v20, 0.0 }
 0x139   :  { %v668_v25 = vpop.f32.mrf.mxu0  ;;  %v796_v26 = vpop.f32.mrf.mxu1 }
 0x13a   :  { %v1422_v27 = vpack.c.bf16 %v862_v23, %v862_v23  ;;  %v1454_v28 = vpack.c.bf16 %v894_v24, %v894_v24  ;;  %v669_v29 = vadd.f32 %v1874_v15, %v668_v25  ;;  %v797_v30 = vadd.f32 %v1874_v15, %v796_v26 }
 0x13b   :  { %v670_v31 = vpop.f32.mrf.mxu0  ;;  %v798_v32 = vpop.f32.mrf.mxu1 }
 0x13c   :  { %1183 = vst.msk [vmem:[%s2199_s3 + $0x4c] sm:$0xf] %vm1163_vm3, %v1422_v27  ;;  %1215 = vst.msk [vmem:[%s2199_s3 + $0xcc] sm:$0xf] %vm1163_vm3, %v1454_v28  ;;  %v863_v33 = vmax.f32 %v669_v29, 0.0  ;;  %v895_v34 = vmax.f32 %v797_v30, 0.0 }
 0x13d   :  { %v671_v35 = vpop.f32.mrf.mxu0  ;;  %v799_v36 = vpop.f32.mrf.mxu1 }
 0x13e   :  { %v1423_v37 = vpack.c.bf16 %v863_v33, %v863_v33  ;;  %v1455_v38 = vpack.c.bf16 %v895_v34, %v895_v34  ;;  %v672_v39 = vadd.f32 %v1874_v15, %v671_v35  ;;  %v800_v40 = vadd.f32 %v1874_v15, %v799_v36 }
 0x13f   :  { %v673_v41 = vpop.f32.mrf.mxu0  ;;  %v801_v42 = vpop.f32.mrf.mxu1 }
 0x140   :  { %1184 = vst.msk [vmem:[%s2199_s3 + $0x50] sm:$0xf] %vm1163_vm3, %v1423_v37  ;;  %1216 = vst.msk [vmem:[%s2199_s3 + $0xd0] sm:$0xf] %vm1163_vm3, %v1455_v38  ;;  %v864_v43 = vmax.f32 %v672_v39, 0.0  ;;  %v896_v44 = vmax.f32 %v800_v40, 0.0 }
 0x141   :  { %v676_v45 = vpop.f32.mrf.mxu0  ;;  %v804_v46 = vpop.f32.mrf.mxu1 }
 0x142   :  { %v1424_v47 = vpack.c.bf16 %v864_v43, %v864_v43  ;;  %v1456_v48 = vpack.c.bf16 %v896_v44, %v896_v44  ;;  %v677_v49 = vadd.f32 %v1874_v15, %v676_v45  ;;  %v805_v50 = vadd.f32 %v1874_v15, %v804_v46 }
 0x143   :  { %v678_v51 = vpop.f32.mrf.mxu0  ;;  %v806_v52 = vpop.f32.mrf.mxu1 }
 0x144   :  { %1185 = vst.msk [vmem:[%s2199_s3 + $0x54] sm:$0xf] %vm1163_vm3, %v1424_v47  ;;  %1217 = vst.msk [vmem:[%s2199_s3 + $0xd4] sm:$0xf] %vm1163_vm3, %v1456_v48  ;;  %v865_v53 = vmax.f32 %v677_v49, 0.0  ;;  %v897_v54 = vmax.f32 %v805_v50, 0.0 }
 0x145   :  { %v679_v55 = vpop.f32.mrf.mxu0  ;;  %v807_v56 = vpop.f32.mrf.mxu1 }
 0x146   :  { %v1425_v57 = vpack.c.bf16 %v865_v53, %v865_v53  ;;  %v1457_v58 = vpack.c.bf16 %v897_v54, %v897_v54  ;;  %v680_v59 = vadd.f32 %v1874_v15, %v679_v55  ;;  %v808_v60 = vadd.f32 %v1874_v15, %v807_v56 }
 0x147   :  { %v681_v61 = vpop.f32.mrf.mxu0  ;;  %v809_v62 = vpop.f32.mrf.mxu1 }
 0x148   :  { %1186 = vst.msk [vmem:[%s2199_s3 + $0x58] sm:$0xf] %vm1163_vm3, %v1425_v57  ;;  %1218 = vst.msk [vmem:[%s2199_s3 + $0xd8] sm:$0xf] %vm1163_vm3, %v1457_v58  ;;  %v866_v63 = vmax.f32 %v680_v59, 0.0  ;;  %v898_v0 = vmax.f32 %v808_v60, 0.0 }
 0x149   :  { %v684_v1 = vpop.f32.mrf.mxu0  ;;  %v812_v2 = vpop.f32.mrf.mxu1 }
 0x14a   :  { %v1426_v3 = vpack.c.bf16 %v866_v63, %v866_v63  ;;  %v1458_v4 = vpack.c.bf16 %v898_v0, %v898_v0  ;;  %v685_v5 = vadd.f32 %v1874_v15, %v684_v1  ;;  %v813_v6 = vadd.f32 %v1874_v15, %v812_v2 }
 0x14b   :  { %v686_v7 = vpop.f32.mrf.mxu0  ;;  %v814_v8 = vpop.f32.mrf.mxu1 }
 0x14c   :  { %1187 = vst.msk [vmem:[%s2199_s3 + $0x5c] sm:$0xf] %vm1163_vm3, %v1426_v3  ;;  %1219 = vst.msk [vmem:[%s2199_s3 + $0xdc] sm:$0xf] %vm1163_vm3, %v1458_v4  ;;  %v867_v9 = vmax.f32 %v685_v5, 0.0  ;;  %v899_v10 = vmax.f32 %v813_v6, 0.0 }
 0x14d   :  { %v687_v11 = vpop.f32.mrf.mxu0  ;;  %v815_v12 = vpop.f32.mrf.mxu1 }
 0x14e   :  { %v1427_v13 = vpack.c.bf16 %v867_v9, %v867_v9  ;;  %v1459_v14 = vpack.c.bf16 %v899_v10, %v899_v10  ;;  %v688_v16 = vadd.f32 %v1874_v15, %v687_v11  ;;  %v816_v17 = vadd.f32 %v1874_v15, %v815_v12 }
 0x14f   :  { %v689_v18 = vpop.f32.mrf.mxu0  ;;  %v817_v19 = vpop.f32.mrf.mxu1 }
 0x150   :  { %1188 = vst.msk [vmem:[%s2199_s3 + $0x60] sm:$0xf] %vm1163_vm3, %v1427_v13  ;;  %1220 = vst.msk [vmem:[%s2199_s3 + $0xe0] sm:$0xf] %vm1163_vm3, %v1459_v14  ;;  %v868_v20 = vmax.f32 %v688_v16, 0.0  ;;  %v900_v21 = vmax.f32 %v816_v17, 0.0 }
 0x151   :  { %v692_v22 = vpop.f32.mrf.mxu0  ;;  %v820_v23 = vpop.f32.mrf.mxu1 }
 0x152   :  { %v1428_v24 = vpack.c.bf16 %v868_v20, %v868_v20  ;;  %v1460_v25 = vpack.c.bf16 %v900_v21, %v900_v21  ;;  %v693_v26 = vadd.f32 %v1874_v15, %v692_v22  ;;  %v821_v27 = vadd.f32 %v1874_v15, %v820_v23 }
 0x153   :  { %v694_v28 = vpop.f32.mrf.mxu0  ;;  %v822_v29 = vpop.f32.mrf.mxu1 }
 0x154   :  { %1189 = vst.msk [vmem:[%s2199_s3 + $0x64] sm:$0xf] %vm1163_vm3, %v1428_v24  ;;  %1221 = vst.msk [vmem:[%s2199_s3 + $0xe4] sm:$0xf] %vm1163_vm3, %v1460_v25  ;;  %v869_v30 = vmax.f32 %v693_v26, 0.0  ;;  %v901_v31 = vmax.f32 %v821_v27, 0.0 }
 0x155   :  { %v695_v32 = vpop.f32.mrf.mxu0  ;;  %v823_v33 = vpop.f32.mrf.mxu1 }
 0x156   :  { %v1429_v34 = vpack.c.bf16 %v869_v30, %v869_v30  ;;  %v1461_v35 = vpack.c.bf16 %v901_v31, %v901_v31  ;;  %v696_v36 = vadd.f32 %v1874_v15, %v695_v32  ;;  %v824_v37 = vadd.f32 %v1874_v15, %v823_v33 }
 0x157   :  { %v697_v38 = vpop.f32.mrf.mxu0  ;;  %v825_v39 = vpop.f32.mrf.mxu1 }
 0x158   :  { %1190 = vst.msk [vmem:[%s2199_s3 + $0x68] sm:$0xf] %vm1163_vm3, %v1429_v34  ;;  %1222 = vst.msk [vmem:[%s2199_s3 + $0xe8] sm:$0xf] %vm1163_vm3, %v1461_v35  ;;  %v870_v40 = vmax.f32 %v696_v36, 0.0  ;;  %v902_v41 = vmax.f32 %v824_v37, 0.0 }
 0x159   :  { %v700_v42 = vpop.f32.mrf.mxu0  ;;  %v828_v43 = vpop.f32.mrf.mxu1 }
 0x15a   :  { %v1430_v44 = vpack.c.bf16 %v870_v40, %v870_v40  ;;  %v1462_v45 = vpack.c.bf16 %v902_v41, %v902_v41  ;;  %v701_v46 = vadd.f32 %v1874_v15, %v700_v42  ;;  %v829_v47 = vadd.f32 %v1874_v15, %v828_v43 }
 0x15b   :  { %v702_v48 = vpop.f32.mrf.mxu0  ;;  %v830_v49 = vpop.f32.mrf.mxu1 }
 0x15c   :  { %1191 = vst.msk [vmem:[%s2199_s3 + $0x6c] sm:$0xf] %vm1163_vm3, %v1430_v44  ;;  %1223 = vst.msk [vmem:[%s2199_s3 + $0xec] sm:$0xf] %vm1163_vm3, %v1462_v45  ;;  %v871_v50 = vmax.f32 %v701_v46, 0.0  ;;  %v903_v51 = vmax.f32 %v829_v47, 0.0 }
 0x15d   :  { %v703_v52 = vpop.f32.mrf.mxu0  ;;  %v831_v53 = vpop.f32.mrf.mxu1 }
 0x15e   :  { %v1431_v54 = vpack.c.bf16 %v871_v50, %v871_v50  ;;  %v1463_v55 = vpack.c.bf16 %v903_v51, %v903_v51  ;;  %v704_v56 = vadd.f32 %v1874_v15, %v703_v52  ;;  %v832_v57 = vadd.f32 %v1874_v15, %v831_v53 }
 0x15f   :  { %v705_v58 = vpop.f32.mrf.mxu0  ;;  %v833_v59 = vpop.f32.mrf.mxu1 }
 0x160   :  { %1192 = vst.msk [vmem:[%s2199_s3 + $0x70] sm:$0xf] %vm1163_vm3, %v1431_v54  ;;  %1224 = vst.msk [vmem:[%s2199_s3 + $0xf0] sm:$0xf] %vm1163_vm3, %v1463_v55  ;;  %v872_v60 = vmax.f32 %v704_v56, 0.0  ;;  %v904_v61 = vmax.f32 %v832_v57, 0.0 }
 0x161   :  { %v708_v62 = vpop.f32.mrf.mxu0  ;;  %v836_v63 = vpop.f32.mrf.mxu1 }
 0x162   :  { %v1432_v0 = vpack.c.bf16 %v872_v60, %v872_v60  ;;  %v1464_v1 = vpack.c.bf16 %v904_v61, %v904_v61  ;;  %v709_v2 = vadd.f32 %v1874_v15, %v708_v62  ;;  %v837_v3 = vadd.f32 %v1874_v15, %v836_v63 }
 0x163   :  { %v710_v4 = vpop.f32.mrf.mxu0  ;;  %v838_v5 = vpop.f32.mrf.mxu1 }
 0x164   :  { %1193 = vst.msk [vmem:[%s2199_s3 + $0x74] sm:$0xf] %vm1163_vm3, %v1432_v0  ;;  %1225 = vst.msk [vmem:[%s2199_s3 + $0xf4] sm:$0xf] %vm1163_vm3, %v1464_v1  ;;  %v873_v6 = vmax.f32 %v709_v2, 0.0  ;;  %v905_v7 = vmax.f32 %v837_v3, 0.0 }
 0x165   :  { %v711_v8 = vpop.f32.mrf.mxu0  ;;  %v839_v9 = vpop.f32.mrf.mxu1 }
 0x166   :  { %v1433_v10 = vpack.c.bf16 %v873_v6, %v873_v6  ;;  %v1465_v11 = vpack.c.bf16 %v905_v7, %v905_v7  ;;  %v712_v12 = vadd.f32 %v1874_v15, %v711_v8  ;;  %v840_v13 = vadd.f32 %v1874_v15, %v839_v9 }
 0x167   :  { %v713_v14 = vpop.f32.mrf.mxu0  ;;  %v841_v16 = vpop.f32.mrf.mxu1 }
 0x168   :  { %1194 = vst.msk [vmem:[%s2199_s3 + $0x78] sm:$0xf] %vm1163_vm3, %v1433_v10  ;;  %1226 = vst.msk [vmem:[%s2199_s3 + $0xf8] sm:$0xf] %vm1163_vm3, %v1465_v11  ;;  %v874_v17 = vmax.f32 %v712_v12, 0.0  ;;  %v906_v18 = vmax.f32 %v840_v13, 0.0 }
 0x16a   :  { %v1434_v19 = vpack.c.bf16 %v874_v17, %v874_v17  ;;  %v1466_v20 = vpack.c.bf16 %v906_v18, %v906_v18 }
 0x16c   :  { %1195 = vst.msk [vmem:[%s2199_s3 + $0x7c] sm:$0xf] %vm1163_vm3, %v1434_v19  ;;  %1227 = vst.msk [vmem:[%s2199_s3 + $0xfc] sm:$0xf] %vm1163_vm3, %v1466_v20 }

</bundles_post_ra>
